<compile_context>
chip_gen: v6e
topology: v6e:2x2x1
jax: 0.10.0
libtpu: 0.0.40
codegen_flags: <defaults>
</compile_context>

<pallas_src>
import numpy as np
import jax
import jax.numpy as jnp
from jax.experimental import pallas as pl
from jax.experimental.pallas import tpu as pltpu


# ----------------------------------------------------------------------------
# Buffer construction (glue; mirrors the PyTorch _get_relative_position_index)
# ----------------------------------------------------------------------------
def get_relative_position_index(win_h, win_w, block_h, block_w):
    coords = np.stack(np.meshgrid(np.arange(win_h), np.arange(win_w), indexing="ij"))  # (2, Wh, Ww)
    coords_flatten = coords.reshape(2, -1)                                             # (2, Wh*Ww)
    relative_coords = coords_flatten[:, :, None] - coords_flatten[:, None, :]          # (2, N, N)
    relative_coords = relative_coords.transpose(1, 2, 0).copy()                        # (N, N, 2)
    relative_coords[:, :, 0] += win_h - 1
    relative_coords[:, :, 1] += win_w - 1
    relative_coords[:, :, 0] *= 2 * win_w - 1
    relative_coords = relative_coords.sum(-1)                                          # (N, N)
    _sh, _sw = (win_h - block_h) // 2, (win_w - block_w) // 2
    relative_coords = relative_coords.reshape(win_h, win_w, win_h, win_w)
    relative_coords = relative_coords[_sh:_sh + block_h, _sw:_sw + block_w, :, 0:win_w]
    relative_coords = relative_coords.reshape(block_h * block_w, win_h * win_w)
    return relative_coords.astype(np.int32)                                            # (block**2, win**2)


# ----------------------------------------------------------------------------
# Pallas kernel: gather as transposed one-hot matmul, strip-wise over T
# ----------------------------------------------------------------------------
_T_STRIP = 128  # contraction-strip width (one lane tile)


def _rel_pos_bias_kernel(idx_ref, table_ref, out_ref):
    # idx_ref   : (1, TILE_PW)             int32   lane-major indices for this tile
    # table_ref : (n_strips, H_pad, 128)   float32 strip-major transposed table
    # out_ref   : (H_pad, TILE_PW)         float32 lane-dense output tile
    idx = idx_ref[...]                                         # (1, TILE_PW)
    n_strips, h_pad, strip = table_ref.shape
    tile_pw = idx.shape[1]

    # Iota is hoisted out of the strip loop (JAX does not CSE broadcast_in_dim);
    # per strip we only shift the narrow index row, not the full-width iota.
    base_iota = jax.lax.broadcasted_iota(jnp.int32, (strip, tile_pw), 0)

    def body(s, acc):
        shifted = idx - s * strip                              # (1, TILE_PW) cheap shift
        onehot_t = (base_iota == shifted).astype(jnp.float32)  # (128, TILE_PW), exact 0/1
        return acc + jnp.dot(table_ref[s], onehot_t,
                             preferred_element_type=jnp.float32)

    acc0 = jnp.zeros((h_pad, tile_pw), jnp.float32)
    out_ref[...] = jax.lax.fori_loop(0, n_strips, body, acc0, unroll=True)


def _round_up(x, m):
    return ((x + m - 1) // m) * m


def _pick_pw_tile(pw_pad):
    # Prefer 256 (hoisted iota + one-hot strip stay near the 64-vreg file), allow 512/128.
    # Require >= 2 tiles when possible so v7x's 2nd TensorCore gets work on the parallel axis.
    for t in (256, 512, 128):
        if pw_pad % t == 0 and pw_pad // t >= 2:
            return t
    for t in (256, 512, 128):
        if pw_pad % t == 0:
            return t
    return pw_pad  # unreachable: pw_pad is a multiple of 128


def compute_rel_pos_bias(rel_pos_table, rel_pos_index, block_size, win_size, num_heads):
    """Returns the relative position bias of shape (1, num_heads, 1, block**2, win**2)."""
    P = block_size * block_size
    W = win_size * win_size
    T = (2 * win_size - 1) * (2 * win_size - 1)
    H = num_heads
    PW = P * W

    T_pad = _round_up(T, _T_STRIP)
    PW_pad = _round_up(PW, 128)
    H_pad = _round_up(H, 8)            # full f32 sublane tile -> unmasked stores / MXU LHS
    TILE_PW = _pick_pw_tile(PW_pad)
    n_strips = T_pad // _T_STRIP

    # Transposed, head-padded table (H_pad, T_pad), then strip-major (n_strips, H_pad, 128)
    # so the kernel reads strip s via first-axis indexing (no dynamic lane slicing).
    table_t = jnp.zeros((H_pad, T_pad), jnp.float32).at[:H, :T].set(
        jnp.transpose(rel_pos_table.astype(jnp.float32)))
    table3 = jnp.transpose(table_t.reshape(H_pad, n_strips, _T_STRIP), (1, 0, 2))

    # Lane-major indices (1, PW_pad); padding entries are -1 (match nothing).
    idx_row = jnp.full((1, PW_pad), -1, jnp.int32).at[0, :PW].set(
        rel_pos_index.reshape(-1).astype(jnp.int32))

    grid = (PW_pad // TILE_PW,)
    cost = pl.CostEstimate(
        flops=2 * H_pad * T_pad * PW_pad,
        transcendentals=0,
        bytes_accessed=idx_row.size * 4 + table3.size * 4 + H_pad * PW_pad * 4,
    )

    out = pl.pallas_call(
        _rel_pos_bias_kernel,
        out_shape=jax.ShapeDtypeStruct((H_pad, PW_pad), jnp.float32),
        grid=grid,
        in_specs=[
            pl.BlockSpec((1, TILE_PW), lambda i: (0, i)),                    # idx tile
            pl.BlockSpec((n_strips, H_pad, _T_STRIP), lambda i: (0, 0, 0)),  # whole table
        ],
        out_specs=pl.BlockSpec((H_pad, TILE_PW), lambda i: (0, i)),          # lane-dense store
        compiler_params=pltpu.CompilerParams(dimension_semantics=("parallel",)),
        cost_estimate=cost,
    )(idx_row, table3)

    # Output is already head-major / lane-dense: slice padding off, plain reshape.
    bias = out[:H, :PW].reshape(H, P, W)     # (heads, block**2, win**2)
    return bias[None, :, None, :, :]         # (1, heads, 1, block**2, win**2)


class QueryFreePosEmbedRel:
    """Mirror of the PyTorch module.  The bias depends only on parameters, so it is
    computed once (single pallas_call) at construction and cached; forward(_) just
    returns the cached array, matching `forward(self, _)` semantics."""

    def __init__(self, block_size, win_size, num_heads, rel_pos_table=None):
        self.block_size = block_size
        self.win_size = win_size
        self.num_heads = num_heads
        T = (2 * win_size - 1) * (2 * win_size - 1)
        if rel_pos_table is None:
            # nn.Parameter init in the PyTorch module is zeros.
            rel_pos_table = jnp.zeros((T, num_heads), jnp.float32)
        self.relative_position_bias_table = rel_pos_table
        self.relative_position_index = jnp.asarray(
            get_relative_position_index(win_size, win_size, block_size, block_size))
        self._cached_bias = compute_rel_pos_bias(
            self.relative_position_bias_table, self.relative_position_index,
            block_size, win_size, num_heads)

    def forward(self, _):
        return self._cached_bias

    __call__ = forward


if __name__ == "__main__":
    block_size, win_size, num_heads = 4, 8, 4

    key = jax.random.PRNGKey(0)
    # Deterministic random table so the gather is actually exercised (module init is zeros).
    rel_pos_table = jax.random.normal(
        key, ((2 * win_size - 1) * (2 * win_size - 1), num_heads), dtype=jnp.float32)

    mod = QueryFreePosEmbedRel(block_size, win_size, num_heads, rel_pos_table)

    # Forward input is ignored by the module; construct it anyway for fidelity.
    x = jax.random.normal(jax.random.PRNGKey(1), (2, 4, 16, 16), dtype=jnp.float32)
    out = jax.block_until_ready(mod(x))

    # Pure-JAX reference of the PyTorch forward.
    P, W = block_size ** 2, win_size * win_size
    ref = rel_pos_table[mod.relative_position_index.reshape(-1)].reshape(P, W, num_heads)
    ref = jnp.transpose(ref, (2, 0, 1))[None, :, None, :, :]

    assert out.shape == (1, num_heads, 1, P, W), out.shape
    np.testing.assert_allclose(np.asarray(out), np.asarray(ref), rtol=1e-6, atol=1e-6)
    print("KERNEL_OK")
</pallas_src>

<mosaic_0001>
module attributes {stable_mosaic.version = 11 : i64} {
  func.func @_rel_pos_bias_kernel(%arg0: i32, %arg1: memref<1x256xi32, #tpu.memory_space<vmem>>, %arg2: memref<2x8x128xf32, #tpu.memory_space<vmem>>, %arg3: memref<8x256xf32, #tpu.memory_space<vmem>>) attributes {dimension_semantics = [#tpu.dimension_semantics<parallel>], iteration_bounds = array<i64: 4>, scalar_prefetch = 0 : i64, scratch_operands = 0 : i64, tpu.core_type = #tpu.core_type<tc>, window_params = [{transform_indices = @transform_0, window_bounds = array<i64: 1, 256>}, {pipeline_mode = #tpu.pipeline_mode<synchronous>, transform_indices = @transform_1, window_bounds = array<i64: 2, 8, 128>}, {transform_indices = @transform_2, window_bounds = array<i64: 8, 256>}]} {
    %c0 = arith.constant 0 : index
    %c0_0 = arith.constant 0 : index
    %0 = vector.load %arg1[%c0, %c0_0] : memref<1x256xi32, #tpu.memory_space<vmem>>, vector<1x256xi32>
    %1 = tpu.iota {dimensions = array<i32: 0>} : vector<128x256xi32>
    %cst = arith.constant 0.000000e+00 : f32
    %2 = vector.broadcast %cst : f32 to vector<8x256xf32>
    %c0_i32 = arith.constant 0 : i32
    %c128_i32 = arith.constant 128 : i32
    %3 = arith.muli %c0_i32, %c128_i32 : i32
    %4 = vector.broadcast %3 : i32 to vector<1x256xi32>
    %5 = arith.subi %0, %4 : vector<1x256xi32>
    %6 = vector.broadcast %5 : vector<1x256xi32> to vector<128x256xi32>
    %7 = arith.cmpi eq, %1, %6 : vector<128x256xi32>
    %8 = arith.extui %7 : vector<128x256xi1> to vector<128x256xi32>
    %9 = arith.sitofp %8 : vector<128x256xi32> to vector<128x256xf32>
    %10 = arith.index_cast %c0_i32 : i32 to index
    %c0_1 = arith.constant 0 : index
    %c0_2 = arith.constant 0 : index
    %11 = vector.load %arg2[%10, %c0_1, %c0_2] : memref<2x8x128xf32, #tpu.memory_space<vmem>>, vector<1x8x128xf32>
    %12 = vector.shape_cast %11 : vector<1x8x128xf32> to vector<8x128xf32>
    %cst_3 = arith.constant dense<0.000000e+00> : vector<8x256xf32>
    %13 = tpu.matmul %12, %9, %cst_3 {dimension_numbers = #tpu.dot_dimension_numbers<[1], [0], [0], [1], [0, 0, 1, 1], [], []>} : vector<8x128xf32>, vector<128x256xf32>, vector<8x256xf32> -> vector<8x256xf32>
    %14 = arith.addf %2, %13 : vector<8x256xf32>
    %c1_i32 = arith.constant 1 : i32
    %c128_i32_4 = arith.constant 128 : i32
    %15 = arith.muli %c1_i32, %c128_i32_4 : i32
    %16 = vector.broadcast %15 : i32 to vector<1x256xi32>
    %17 = arith.subi %0, %16 : vector<1x256xi32>
    %18 = vector.broadcast %17 : vector<1x256xi32> to vector<128x256xi32>
    %19 = arith.cmpi eq, %1, %18 : vector<128x256xi32>
    %20 = arith.extui %19 : vector<128x256xi1> to vector<128x256xi32>
    %21 = arith.sitofp %20 : vector<128x256xi32> to vector<128x256xf32>
    %22 = arith.index_cast %c1_i32 : i32 to index
    %c0_5 = arith.constant 0 : index
    %c0_6 = arith.constant 0 : index
    %23 = vector.load %arg2[%22, %c0_5, %c0_6] : memref<2x8x128xf32, #tpu.memory_space<vmem>>, vector<1x8x128xf32>
    %24 = vector.shape_cast %23 : vector<1x8x128xf32> to vector<8x128xf32>
    %cst_7 = arith.constant dense<0.000000e+00> : vector<8x256xf32>
    %25 = tpu.matmul %24, %21, %cst_7 {dimension_numbers = #tpu.dot_dimension_numbers<[1], [0], [0], [1], [0, 0, 1, 1], [], []>} : vector<8x128xf32>, vector<128x256xf32>, vector<8x256xf32> -> vector<8x256xf32>
    %26 = arith.addf %14, %25 : vector<8x256xf32>
    %c2_i32 = arith.constant 2 : i32
    %c0_8 = arith.constant 0 : index
    %c0_9 = arith.constant 0 : index
    %27 = vector.load %arg3[%c0_8, %c0_9] : memref<8x256xf32, #tpu.memory_space<vmem>>, vector<8x256xf32>
    tpu.vector_store %arg3[%c0_8, %c0_9], %26 {strides = array<i32>} : memref<8x256xf32, #tpu.memory_space<vmem>>, vector<8x256xf32>,
    return
  }
  func.func @transform_0(%arg0: i32) -> (i32, i32) {
    %c0_i32 = arith.constant 0 : i32
    %c0_i32_0 = arith.constant 0 : i32
    return %c0_i32, %arg0 : i32, i32
  }
  func.func @transform_1(%arg0: i32) -> (i32, i32, i32) {
    %c0_i32 = arith.constant 0 : i32
    %c0_i32_0 = arith.constant 0 : i32
    %c0_i32_1 = arith.constant 0 : i32
    %c0_i32_2 = arith.constant 0 : i32
    return %c0_i32, %c0_i32_0, %c0_i32_1 : i32, i32, i32
  }
  func.func @transform_2(%arg0: i32) -> (i32, i32) {
    %c0_i32 = arith.constant 0 : i32
    %c0_i32_0 = arith.constant 0 : i32
    return %c0_i32, %arg0 : i32, i32
  }
}

</mosaic_0001>

<bundles_post_ra>
// kernel: tpu_custom_call.1
= control target key start
LH: loop header
LB: loop body
LE: loop exit
PB: predicated region body
PF: predicated region fallthrough
CT: control target
= control target key end

     0   :  { %7 = vsyncpa [#allocation3], 0  ;;  %s1312_s0 = inlined_call_operand.hbm [shape: s32[1,1024], index: 0, kind: input, shape index: {}]   ;;  %s1313_s1 = inlined_call_operand.hbm [shape: f32[2,8,128], index: 1, kind: input, shape index: {}]   ;;  %s1314_s2 = inlined_call_operand.hbm [shape: f32[8,1024], index: 2, kind: output, shape index: {}]  }
   0x1   :  { %9 = vsyncpa [#allocation3 + $0x1], 0 }
   0x2   :  { %10 = vsyncpa [#allocation6], 0 }
   0x3   :  { %11 = vsyncpa [#allocation4], 0 }
   0x4   :  { %13 = vsyncpa [#allocation4 + $0x1], 0  ;;  %s1000_s9 = smov 0   ;;  %s1002_s10 = smov 0  }
   0x5   :  { %s1004_s11 = smov 0   ;;  %s1006_s12 = smov 0  }
   0x6 LB: > { %s1021_s13 = sadd.s32 4294967295, %s976_s12   ;;  %s646_s14 = sadd.s32 4294967294, %s976_s12   ;;  %s976_s12 = sphi %s1006_s12, %s1335_s12   ;;  %s972_s11 = sphi %s1004_s11, %s1334_s11   ;;  %s968_s10 = sphi %s1002_s10, %s1333_s10   ;;  %s964_s9 = sphi %s1000_s9, %s1332_s9  }
   0x7   : > { %p39_p0 = scmp.ne.s32.totalorder %s968_s10, %s964_s9  ;;  %p1315_p1 = scmp.eq.s32.totalorder %s1021_s13, 0 }
   0x8   : > { %p90_p3 = scmp.eq.s32.totalorder %s646_s14, 3  ;;  %p647_p5 = scmp.ge.s32.totalorder %s976_s12, 1 }
   0x9   : > { %p1030_p4 = por %p1315_p1, %p39_p0  ;;  %p97_p7 = scmp.lt.s32.totalorder %s976_s12, 5 }
   0xa   : > { %p1035_p6 = por %p90_p3, %p39_p0  ;;  %s978_s18 = smov [#allocation5]  }
   0xb   : > { %s1319_s15 = scalar_select %p1030_p4, 1, 0 }
   0xc   : > { %s1320_s16 = scalar_select %p1035_p6, 1, 0 }
   0xd   : > { %p1040_p8 = pnand %p647_p5, %p97_p7  ;;  %s109_s19 = sshll.u32 %s978_s18, 4  ;;  %s110_s19 = int_to_ptr.vmem [resolvable:$true] %s109_s19 }
   0xe   : > { %s1053_s21 = sadd.s32 1, %s976_s12   ;;  %s26_s22 = sadd.s32 1, %s972_s11 }
   0xf   : > { %s1321_s17 = scalar_select %p1040_p8, 1, 0 }
  0x10   : > { %p801_p9 = pneg %p1040_p8  ;;  %s23_s23 = ssub.s32 %s976_s12, %s1053_s21 }
  0x11   : > { %s865_s24 = scalar_lea.vmem %s110_s19, 256  ;;  %p873_p3 = scmp.lt.s32.totalorder %s110_s19, %s110_s19 }
  0x12   : > { %p1048_p10 = pnand %p801_p9, %p1315_p1  ;;  %p866_p12 = scmp.ne.s32.totalorder %s110_s19, %s865_s24 }
  0x13   : > { %p874_p5 = scmp.lt.s32.totalorder %s865_s24, %s865_s24 }
  0x14   : > { %p856_p11 = pneg %p1048_p10 }
  0x15   : > { %p875_p7 = por %p874_p5, %p873_p3 }
  0x16   : > { %p868_p13 = pnand %p866_p12, %p856_p11 }
  0x18   : > { %p869_p0 = pneg %p868_p13 }
  0x1a   : > { %p876_p2 = pnand %p875_p7, %p869_p0 }
  0x1c   : > { %879 = shalt.err (!%p876_p2)
}
  0x1d   : > { %s979_s25 = smov 128   ;;  %s980_s26 = smov 8  }
  0x1e   : > { %804 = dma.hbm_to_vmem [thread:$0]  (!%p1048_p10), %s1313_s1, 256, %s110_s19, [#allocation6], %s979_s25, %s979_s25, %s980_s26  }
  0x1f   : > { %p24_p9 = scmp.eq.s32.totalorder %s23_s23, 0  ;;  %p33_p11 = scmp.ne.s32.totalorder %s972_s11, %s968_s10 }
  0x20   : > { %p34_p12 = scmp.eq.s32.totalorder %s976_s12, 0  ;;  %p814_p2 = scmp.lt.s32.totalorder %s976_s12, 4 }
  0x21   : > { %s1070_s29 = scalar_select %p24_p9, %s972_s11, %s26_s22  }
  0x22   : > { %p35_p13 = por %p34_p12, %p33_p11  ;;  %p1323_p0 = scmp.eq.s32.totalorder %s1021_s13, 3 }
  0x23   : > { %s123_s3 = sand.u32 1, %s972_s11   ;;  %s791_s4 = sshll.u32 %s976_s12, 5 }
  0x24   : > { %p1074_p3 = por %p1323_p0, %p33_p11  ;;  %s650_s5 = sshll.u32 %s123_s3, 1 }
  0x25   : > { %s1083_s8 = scalar_lea.hbm %s1312_s0, %s791_s4  ;;  %s127_s14 = scalar_lea.vmem [#allocation2], %s650_s5 }
  0x26   : > { %s1324_s30 = scalar_select %p1074_p3, 1, 0 }
  0x27   : > { %s135_s18 = sshll.u32 %s127_s14, 4  ;;  %p1085_p10 = pnand %p814_p2, %p35_p13  ;;  %s136_s18 = int_to_ptr.vmem [resolvable:$true] %s135_s18 }
  0x28   : > { %s124_s20 = scalar_lea.sflag [#allocation3], %s123_s3  ;;  %s880_s22 = scalar_lea.hbm %s1083_s8, 32 }
  0x29   : > { %p881_p5 = scmp.ne.s32.totalorder %s1083_s8, %s880_s22  ;;  %p882_p7 = pneg %p1085_p10 }
  0x2a   : > { %s885_s25 = scalar_lea.hbm %s1312_s0, 128  ;;  %p886_p12 = scmp.lt.s32.totalorder %s1083_s8, %s1312_s0 }
  0x2b   : > { %p883_p9 = pnand %p882_p7, %p881_p5  ;;  %p887_p2 = scmp.lt.s32.totalorder %s885_s25, %s880_s22 }
  0x2d   : > { %p884_p11 = pneg %p883_p9  ;;  %p888_p13 = por %p887_p2, %p886_p12 }
  0x2f   : > { %p889_p0 = pnand %p888_p13, %p884_p11 }
  0x31   : > { %892 = shalt.err (!%p889_p0)
}
  0x32   : > { %s893_s28 = scalar_lea.vmem %s136_s18, 32  ;;  %s981_s3 = smov [#allocation2]  }
  0x33   : > { %p894_p1 = scmp.ne.s32.totalorder %s136_s18, %s893_s28  ;;  %s898_s4 = sshll.u32 %s981_s3, 4  ;;  %s899_s4 = int_to_ptr.vmem [resolvable:$false] %s898_s4 }
  0x34   : > { %s900_s5 = scalar_lea.vmem %s899_s4, 64  ;;  %p901_p5 = scmp.lt.s32.totalorder %s136_s18, %s899_s4 }
  0x35   : > { %p896_p6 = pnand %p894_p1, %p882_p7  ;;  %p902_p9 = scmp.lt.s32.totalorder %s900_s5, %s893_s28 }
  0x37   : > { %p897_p3 = pneg %p896_p6  ;;  %p903_p4 = por %p902_p9, %p901_p5 }
  0x39   : > { %p904_p8 = pnand %p903_p4, %p897_p3 }
  0x3b   : > { %907 = shalt.err (!%p904_p8)
}
  0x3c   : > { %808 = dma.hbm_to_vmem [thread:$0]  (!%p1085_p10), %s1083_s8, 32, %s136_s18, %s124_s20  }
  0x3d   : > { %p1326_p11 = scmp.ne.s32.totalorder %s1321_s17, 0 }
  0x3e   : > { %s1106_s6 = sand.u32 (!%p1326_p11), 1, %s968_s10   ;;  %p1327_p1 = scmp.ne.s32.totalorder (!%p1326_p11), %s1319_s15, 0 }
  0x3f   : > { %144 = sbr.rel (%p1326_p11) target bundleno = 324 (0x144), region = 28  ;;  %s654_s7 = sshll.u32 (!%p1326_p11), %s1106_s6, 1 }
  0x40   : > { %s147_s14 = scalar_lea.sflag (!%p1326_p11), [#allocation3], %s1106_s6  ;;  %s150_s22 = scalar_lea.vmem (!%p1326_p11), [#allocation2], %s654_s7 }
  0x44   : > { %951 = dma.done.wait (%p1327_p1), %s147_s14, 32  }
  0x45   : > { %953 = vsyncadd (%p1327_p1), %s147_s14, 4294967264  ;;  %p1328_p4 = scmp.eq.s32.totalorder %s1021_s13, 0 }
  0x47   : > { %955 = dma.done.wait (%p1328_p4), [#allocation6], 256   ;;  %p1329_p6 = pmov %p1328_p4 }
  0x48   : > { %v178_v0 = vlaneseq  ;;  %v982_v1 = vmov 0.0   ;;  %v177_v6 = vld [vmem:[%s150_s22] sm:$0x3]  ;;  %v983_v15 = vmov 1.0   ;;  %v299_v27 = vld [vmem:[#allocation5] sm:$0xff]  ;;  %v406_v28 = vld [vmem:[#allocation5 + $0x8] sm:$0xff] }
  0x49   : > { %957 = vsyncadd (%p1329_p6), [#allocation6], 4294967040  ;;  %542 = vmatprep.mubr.f32.mxu1 %v982_v1  ;;  %471 = vmatprep.mubr.f32.mxu0 %v982_v1  ;;  %v689_v10 = vadd.s32 4294967168, %v177_v6  ;;  %s656_s15 = sshll.u32 %s1106_s6, 4  ;;  %s792_s17 = sshll.u32 %s1021_s13, 8 }
  0x4a   : > { %v1118_v2 = vshrl.u32 %v178_v0, 7  ;;  %s174_s8 = scalar_lea.vmem [#allocation7], %s656_s15  ;;  %s564_s23 = scalar_lea.hbm %s1314_s2, %s792_s17 }
  0x4b   : > { %s566_s18 = sshll.u32 %s174_s8, 4  ;;  %s552_s24 = scalar_lea.sflag [#allocation4], %s1106_s6  ;;  %s567_s18 = int_to_ptr.vmem [resolvable:$true] %s566_s18 }
  0x4c   : > { %v197_v3 = vsub.s32 0, %v1118_v2  ;;  %v201_v4 = vsub.s32 1, %v1118_v2  ;;  %v194_v5 = vadd.s32 120, %v1118_v2  ;;  %v193_v7 = vadd.s32 112, %v1118_v2  ;;  %s908_s25 = scalar_lea.vmem %s567_s18, 256  ;;  %p1330_p3 = scmp.ne.s32.totalorder %s1324_s30, 0 }
  0x4d   : > { %v192_v11 = vadd.s32 104, %v1118_v2  ;;  %v191_v12 = vadd.s32 96, %v1118_v2  ;;  %v190_v16 = vadd.s32 88, %v1118_v2  ;;  %v189_v17 = vadd.s32 80, %v1118_v2  ;;  %p909_p8 = scmp.ne.s32.totalorder %s567_s18, %s908_s25  ;;  %s984_s13 = smov [#allocation7]  }
  0x4e   : > { %v1124_v8 = vrot.slane %v177_v6, %v197_v3  ;;  %v1126_v9 = vrot.slane %v177_v6, %v201_v4  ;;  %v1130_v13 = vrot.slane %v689_v10, %v197_v3  ;;  %v1132_v14 = vrot.slane %v689_v10, %v201_v4  ;;  %s912_s26 = sshll.u32 %s984_s13, 4  ;;  %s913_s26 = int_to_ptr.vmem [resolvable:$false] %s912_s26 }
  0x4f   : > { %v188_v18 = vadd.s32 72, %v1118_v2  ;;  %v187_v19 = vadd.s32 64, %v1118_v2  ;;  %v186_v20 = vadd.s32 56, %v1118_v2  ;;  %v185_v21 = vadd.s32 48, %v1118_v2  ;;  %p910_p10 = pnand %p909_p8, %p1330_p3  ;;  %s914_s27 = scalar_lea.vmem %s913_s26, 512 }
  0x50   : > { %vm234_vm0 = vcmp.eq.s32.totalorder %v194_v5, %v1126_v9  ;;  %vm233_vm1 = vcmp.eq.s32.totalorder %v194_v5, %v1124_v8  ;;  %vm232_vm2 = vcmp.eq.s32.totalorder %v193_v7, %v1126_v9  ;;  %vm231_vm3 = vcmp.eq.s32.totalorder %v193_v7, %v1124_v8  ;;  %p915_p12 = scmp.lt.s32.totalorder %s567_s18, %s913_s26  ;;  %p916_p2 = scmp.lt.s32.totalorder %s914_s27, %s908_s25 }
  0x51   : > { %754 = vmatprep.subr.msk.mxu1 %vm234_vm0, %v983_v15  ;;  %vm340_vm4 = vcmp.eq.s32.totalorder %v194_v5, %v1132_v14  ;;  %vm339_vm5 = vcmp.eq.s32.totalorder %v194_v5, %v1130_v13  ;;  %vm338_vm6 = vcmp.eq.s32.totalorder %v193_v7, %v1132_v14  ;;  %vm230_vm7 = vcmp.eq.s32.totalorder %v192_v11, %v1126_v9  ;;  %p911_p7 = pneg %p910_p10 }
  0x52   : > { %755 = vmatpush1.msk.msra.mxu1 %vm233_vm1, %v983_v15  ;;  %722 = vmatprep.subr.msk.mxu0 %vm340_vm4, %v983_v15  ;;  %vm337_vm8 = vcmp.eq.s32.totalorder %v193_v7, %v1130_v13  ;;  %vm229_vm9 = vcmp.eq.s32.totalorder %v192_v11, %v1124_v8  ;;  %vm336_vm10 = vcmp.eq.s32.totalorder %v192_v11, %v1132_v14  ;;  %v184_v22 = vadd.s32 40, %v1118_v2  ;;  %p917_p13 = por %p916_p2, %p915_p12 }
  0x53   : > { %756 = vmatprep.subr.msk.mxu1 %vm232_vm2, %v983_v15  ;;  %723 = vmatpush1.msk.msra.mxu0 %vm339_vm5, %v983_v15  ;;  %vm228_vm11 = vcmp.eq.s32.totalorder %v191_v12, %v1126_v9  ;;  %vm335_vm12 = vcmp.eq.s32.totalorder %v192_v11, %v1130_v13  ;;  %vm227_vm13 = vcmp.eq.s32.totalorder %v191_v12, %v1124_v8  ;;  %v183_v23 = vadd.s32 32, %v1118_v2 }
  0x54   : > { %757 = vmatpush1.msk.msra.mxu1 %vm231_vm3, %v983_v15  ;;  %724 = vmatprep.subr.msk.mxu0 %vm338_vm6, %v983_v15  ;;  %vm334_vm14 = vcmp.eq.s32.totalorder %v191_v12, %v1132_v14  ;;  %vm226_vm15 = vcmp.eq.s32.totalorder %v190_v16, %v1126_v9  ;;  %vm333_vm0 = vcmp.eq.s32.totalorder %v191_v12, %v1130_v13  ;;  %v182_v24 = vadd.s32 24, %v1118_v2  ;;  %p918_p0 = pnand %p917_p13, %p911_p7 }
  0x55   : > { %758 = vmatprep.subr.msk.mxu1 %vm230_vm7, %v983_v15  ;;  %725 = vmatpush1.msk.msra.mxu0 %vm337_vm8, %v983_v15  ;;  %vm225_vm1 = vcmp.eq.s32.totalorder %v190_v16, %v1124_v8  ;;  %vm332_vm2 = vcmp.eq.s32.totalorder %v190_v16, %v1132_v14  ;;  %vm224_vm3 = vcmp.eq.s32.totalorder %v189_v17, %v1126_v9  ;;  %v181_v25 = vadd.s32 16, %v1118_v2 }
  0x56   : > { %759 = vmatpush1.msk.msra.mxu1 %vm229_vm9, %v983_v15  ;;  %726 = vmatprep.subr.msk.mxu0 %vm336_vm10, %v983_v15  ;;  %vm331_vm4 = vcmp.eq.s32.totalorder %v190_v16, %v1130_v13  ;;  %vm223_vm5 = vcmp.eq.s32.totalorder %v189_v17, %v1124_v8  ;;  %vm330_vm6 = vcmp.eq.s32.totalorder %v189_v17, %v1132_v14  ;;  %v180_v26 = vadd.s32 8, %v1118_v2 }
  0x57   : > { %760 = vmatprep.subr.msk.mxu1 %vm228_vm11, %v983_v15  ;;  %727 = vmatpush1.msk.msra.mxu0 %vm335_vm12, %v983_v15  ;;  %vm222_vm7 = vcmp.eq.s32.totalorder %v188_v18, %v1126_v9  ;;  %vm329_vm8 = vcmp.eq.s32.totalorder %v189_v17, %v1130_v13  ;;  %vm221_vm9 = vcmp.eq.s32.totalorder %v188_v18, %v1124_v8 }
  0x58   : > { %761 = vmatpush1.msk.msra.mxu1 %vm227_vm13, %v983_v15  ;;  %728 = vmatprep.subr.msk.mxu0 %vm334_vm14, %v983_v15  ;;  %vm328_vm10 = vcmp.eq.s32.totalorder %v188_v18, %v1132_v14  ;;  %vm220_vm11 = vcmp.eq.s32.totalorder %v187_v19, %v1126_v9  ;;  %vm327_vm12 = vcmp.eq.s32.totalorder %v188_v18, %v1130_v13 }
  0x59   : > { %762 = vmatprep.subr.msk.mxu1 %vm226_vm15, %v983_v15  ;;  %729 = vmatpush1.msk.msra.mxu0 %vm333_vm0, %v983_v15  ;;  %vm219_vm13 = vcmp.eq.s32.totalorder %v187_v19, %v1124_v8  ;;  %vm326_vm14 = vcmp.eq.s32.totalorder %v187_v19, %v1132_v14  ;;  %vm218_vm15 = vcmp.eq.s32.totalorder %v186_v20, %v1126_v9 }
  0x5a   : > { %763 = vmatpush1.msk.msra.mxu1 %vm225_vm1, %v983_v15  ;;  %730 = vmatprep.subr.msk.mxu0 %vm332_vm2, %v983_v15  ;;  %vm325_vm0 = vcmp.eq.s32.totalorder %v187_v19, %v1130_v13  ;;  %vm217_vm1 = vcmp.eq.s32.totalorder %v186_v20, %v1124_v8  ;;  %vm324_vm2 = vcmp.eq.s32.totalorder %v186_v20, %v1132_v14 }
  0x5b   : > { %764 = vmatprep.subr.msk.mxu1 %vm224_vm3, %v983_v15  ;;  %731 = vmatpush1.msk.msra.mxu0 %vm331_vm4, %v983_v15  ;;  %vm216_vm3 = vcmp.eq.s32.totalorder %v185_v21, %v1126_v9  ;;  %vm323_vm4 = vcmp.eq.s32.totalorder %v186_v20, %v1130_v13 }
  0x5c   : > { %765 = vmatpush1.msk.msra.mxu1 %vm223_vm5, %v983_v15  ;;  %732 = vmatprep.subr.msk.mxu0 %vm330_vm6, %v983_v15  ;;  %vm215_vm5 = vcmp.eq.s32.totalorder %v185_v21, %v1124_v8  ;;  %vm322_vm6 = vcmp.eq.s32.totalorder %v185_v21, %v1132_v14 }
  0x5d   : > { %766 = vmatprep.subr.msk.mxu1 %vm222_vm7, %v983_v15  ;;  %733 = vmatpush1.msk.msra.mxu0 %vm329_vm8, %v983_v15  ;;  %vm214_vm7 = vcmp.eq.s32.totalorder %v184_v22, %v1126_v9  ;;  %vm321_vm8 = vcmp.eq.s32.totalorder %v185_v21, %v1130_v13 }
  0x5e   : > { %767 = vmatpush1.msk.msra.mxu1 %vm221_vm9, %v983_v15  ;;  %734 = vmatprep.subr.msk.mxu0 %vm328_vm10, %v983_v15  ;;  %vm213_vm9 = vcmp.eq.s32.totalorder %v184_v22, %v1124_v8  ;;  %vm320_vm10 = vcmp.eq.s32.totalorder %v184_v22, %v1132_v14 }
  0x5f   : > { %768 = vmatprep.subr.msk.mxu1 %vm220_vm11, %v983_v15  ;;  %735 = vmatpush1.msk.msra.mxu0 %vm327_vm12, %v983_v15  ;;  %vm212_vm11 = vcmp.eq.s32.totalorder %v183_v23, %v1126_v9  ;;  %vm319_vm12 = vcmp.eq.s32.totalorder %v184_v22, %v1130_v13 }
  0x60   : > { %769 = vmatpush1.msk.msra.mxu1 %vm219_vm13, %v983_v15  ;;  %736 = vmatprep.subr.msk.mxu0 %vm326_vm14, %v983_v15  ;;  %vm211_vm13 = vcmp.eq.s32.totalorder %v183_v23, %v1124_v8  ;;  %vm318_vm14 = vcmp.eq.s32.totalorder %v183_v23, %v1132_v14 }
  0x61   : > { %770 = vmatprep.subr.msk.mxu1 %vm218_vm15, %v983_v15  ;;  %737 = vmatpush1.msk.msra.mxu0 %vm325_vm0, %v983_v15  ;;  %vm210_vm15 = vcmp.eq.s32.totalorder %v182_v24, %v1126_v9  ;;  %vm317_vm0 = vcmp.eq.s32.totalorder %v183_v23, %v1130_v13 }
  0x62   : > { %771 = vmatpush1.msk.msra.mxu1 %vm217_vm1, %v983_v15  ;;  %738 = vmatprep.subr.msk.mxu0 %vm324_vm2, %v983_v15  ;;  %vm209_vm1 = vcmp.eq.s32.totalorder %v182_v24, %v1124_v8  ;;  %vm316_vm2 = vcmp.eq.s32.totalorder %v182_v24, %v1132_v14 }
  0x63   : > { %772 = vmatprep.subr.msk.mxu1 %vm216_vm3, %v983_v15  ;;  %739 = vmatpush1.msk.msra.mxu0 %vm323_vm4, %v983_v15  ;;  %vm208_vm3 = vcmp.eq.s32.totalorder %v181_v25, %v1126_v9  ;;  %vm315_vm4 = vcmp.eq.s32.totalorder %v182_v24, %v1130_v13 }
  0x64   : > { %773 = vmatpush1.msk.msra.mxu1 %vm215_vm5, %v983_v15  ;;  %740 = vmatprep.subr.msk.mxu0 %vm322_vm6, %v983_v15  ;;  %vm207_vm5 = vcmp.eq.s32.totalorder %v181_v25, %v1124_v8  ;;  %vm314_vm6 = vcmp.eq.s32.totalorder %v181_v25, %v1132_v14 }
  0x65   : > { %774 = vmatprep.subr.msk.mxu1 %vm214_vm7, %v983_v15  ;;  %741 = vmatpush1.msk.msra.mxu0 %vm321_vm8, %v983_v15  ;;  %vm206_vm7 = vcmp.eq.s32.totalorder %v180_v26, %v1126_v9  ;;  %vm313_vm8 = vcmp.eq.s32.totalorder %v181_v25, %v1130_v13 }
  0x66   : > { %775 = vmatpush1.msk.msra.mxu1 %vm213_vm9, %v983_v15  ;;  %742 = vmatprep.subr.msk.mxu0 %vm320_vm10, %v983_v15  ;;  %vm205_vm9 = vcmp.eq.s32.totalorder %v180_v26, %v1124_v8  ;;  %vm312_vm10 = vcmp.eq.s32.totalorder %v180_v26, %v1132_v14 }
  0x67   : > { %776 = vmatprep.subr.msk.mxu1 %vm212_vm11, %v983_v15  ;;  %743 = vmatpush1.msk.msra.mxu0 %vm319_vm12, %v983_v15  ;;  %vm204_vm11 = vcmp.eq.s32.totalorder %v1118_v2, %v1126_v9  ;;  %vm311_vm12 = vcmp.eq.s32.totalorder %v180_v26, %v1130_v13 }
  0x68   : > { %777 = vmatpush1.msk.msra.mxu1 %vm211_vm13, %v983_v15  ;;  %744 = vmatprep.subr.msk.mxu0 %vm318_vm14, %v983_v15  ;;  %vm203_vm13 = vcmp.eq.s32.totalorder %v1118_v2, %v1124_v8  ;;  %vm310_vm14 = vcmp.eq.s32.totalorder %v1118_v2, %v1132_v14 }
  0x69   : > { %778 = vmatprep.subr.msk.mxu1 %vm210_vm15, %v983_v15  ;;  %745 = vmatpush1.msk.msra.mxu0 %vm317_vm0, %v983_v15  ;;  %vm309_vm15 = vcmp.eq.s32.totalorder %v1118_v2, %v1130_v13 }
  0x6a   : > { %779 = vmatpush1.msk.msra.mxu1 %vm209_vm1, %v983_v15  ;;  %746 = vmatprep.subr.msk.mxu0 %vm316_vm2, %v983_v15 }
  0x6b   : > { %780 = vmatprep.subr.msk.mxu1 %vm208_vm3, %v983_v15  ;;  %747 = vmatpush1.msk.msra.mxu0 %vm315_vm4, %v983_v15 }
  0x6c   : > { %781 = vmatpush1.msk.msra.mxu1 %vm207_vm5, %v983_v15  ;;  %748 = vmatprep.subr.msk.mxu0 %vm314_vm6, %v983_v15 }
  0x6d   : > { %782 = vmatprep.subr.msk.mxu1 %vm206_vm7, %v983_v15  ;;  %749 = vmatpush1.msk.msra.mxu0 %vm313_vm8, %v983_v15 }
  0x6e   : > { %783 = vmatpush1.msk.msra.mxu1 %vm205_vm9, %v983_v15  ;;  %750 = vmatprep.subr.msk.mxu0 %vm312_vm10, %v983_v15 }
  0x6f   : > { %784 = vmatprep.subr.msk.mxu1 %vm204_vm11, %v983_v15  ;;  %751 = vmatpush1.msk.msra.mxu0 %vm311_vm12, %v983_v15 }
  0x70   : > { %785 = vmatpush1.msk.msra.mxu1 %vm203_vm13, %v983_v15  ;;  %752 = vmatprep.subr.msk.mxu0 %vm310_vm14, %v983_v15 }
  0x71   : > { %543 = vmatmul.mubr.f32.vlgmr.msra.gmra.mxu1 %v299_v27  ;;  %753 = vmatpush1.msk.msra.mxu0 %vm309_vm15, %v983_v15 }
  0x72   : > { %472 = vmatmul.mubr.f32.vlgmr.msra.gmra.mxu0 %v406_v28 }
 0x131   : > { %v544_v29 = vpop.f32.mrf.mxu1 }
 0x132   : > { %v473_v30 = vpop.f32.mrf.mxu0 }
 0x133   : > { %v545_v31 = vadd.f32 %v544_v29, %v473_v30  ;;  %v546_v32 = vpop.f32.mrf.mxu1 }
 0x134   : > { %v475_v33 = vpop.f32.mrf.mxu0 }
 0x135   : > { %549 = vst [vmem:[%s174_s8] sm:$0xff] %v545_v31  ;;  %v547_v34 = vadd.f32 %v546_v32, %v475_v33 }
 0x137   : > { %550 = vst [vmem:[%s174_s8 + $0x8] sm:$0xff] %v547_v34 }
 0x138   : > { %921 = shalt.err (!%p918_p0)
}
 0x139   : > { %s922_s28 = scalar_lea.hbm %s564_s23, 256  ;;  %s926_s5 = scalar_lea.hbm %s1314_s2, 1024 }
 0x13a   : > { %p923_p5 = scmp.ne.s32.totalorder %s564_s23, %s922_s28  ;;  %p927_p1 = scmp.lt.s32.totalorder %s564_s23, %s1314_s2 }
 0x13b   : > { %p928_p4 = scmp.lt.s32.totalorder %s926_s5, %s922_s28 }
 0x13c   : > { %p924_p9 = pnand %p923_p5, %p1330_p3 }
 0x13d   : > { %p929_p6 = por %p928_p4, %p927_p1 }
 0x13e   : > { %p925_p11 = pneg %p924_p9 }
 0x140   : > { %p930_p8 = pnand %p929_p6, %p925_p11 }
 0x142   : > { %933 = shalt.err (!%p930_p8)
}
 0x143   : > { %799 = dma.vmem_to_hbm [thread:$0]  (%p1330_p3), %s567_s18, 256, %s564_s23, %s552_s24  }
 0x144 PF: > { %p816_p10 = scmp.ge.s32.totalorder %s976_s12, 2  ;;  %s578_s14 = sand.u32 1, %s964_s9  }
 0x145   : > { %p1331_p7 = scmp.ne.s32.totalorder %s1320_s16, 0  ;;  %s579_s22 = scalar_lea.sflag [#allocation4], %s578_s14 }
 0x147   : > { %p810_p12 = pnand %p816_p10, %p1331_p7 }
 0x149   : > { %p811_p2 = pneg %p810_p12 }
 0x14b   : > { %959 = dma.done.wait (%p811_p2), %s579_s22, 256  }
 0x14c   : > { %961 = vsyncadd (%p811_p2), %s579_s22, 4294967040  ;;  %p16_p13 = scmp.ge.s32.totalorder %s1053_s21, 6   ;;  %s1332_s9 = smov %s968_s10 }
 0x14d   : > { %s1333_s10 = smov %s972_s11  ;;  %s1334_s11 = smov %s1070_s29 }
 0x14e   : > { %s1335_s12 = smov %s1053_s21  ;;  %18 = sbr.rel (!%p16_p13) target bundleno = 6 (0x6), region = 78 }
 0x153   :  { %584 = vsyncpa [#allocation3], 1 }
 0x154   :  { %586 = vsyncpa [#allocation3 + $0x1], 1 }
 0x155   :  { %587 = vsyncpa [#allocation6], 1 }
 0x156   :  { %588 = vsyncpa [#allocation4], 1 }
 0x157   :  { %590 = vsyncpa [#allocation4 + $0x1], 1 }

</bundles_post_ra>
